<compile_context>
chip_gen: v7x
topology: tpu7x:2x2x1
jax: 0.10.0
libtpu: 0.0.40
codegen_flags: <defaults>
</compile_context>

<pallas_src>
import functools
import math

import jax
import jax.numpy as jnp
from jax.experimental import pallas as pl
from jax.experimental.pallas import tpu as pltpu

LANE = 128


def _round_up(n, m):
    return ((n + m - 1) // m) * m


def _mlp_kernel(x_ref, w1_ref, b1_ref, w2_ref, b2_ref, w3_ref, b3_ref, o_ref):
    # bf16 operands on the MXU, f32 accumulation. The bf16 cast of x happens
    # here (cheap VPU op) instead of as an extra XLA pass over HBM outside.
    x = x_ref[...].astype(jnp.bfloat16)
    # fc1 + relu
    h1 = jnp.dot(x, w1_ref[...], preferred_element_type=jnp.float32)
    h1 = jnp.maximum(h1 + b1_ref[...], 0.0)
    # fc2 + relu
    h2 = jnp.dot(h1.astype(jnp.bfloat16), w2_ref[...],
                 preferred_element_type=jnp.float32)
    h2 = jnp.maximum(h2 + b2_ref[...], 0.0)
    # dropout: identity in eval mode
    # fc3 -- store bf16 to halve the output HBM stream
    o = jnp.dot(h2.astype(jnp.bfloat16), w3_ref[...],
                preferred_element_type=jnp.float32) + b3_ref[...]
    o_ref[...] = o.astype(o_ref.dtype)


def prepare_params(w1, b1, w2, b2, w3, b3):
    """Pad feature dims to 128-lane multiples and cast ONCE (hot-path hoist).

    Weights become bf16 (MXU-native); biases stay f32 (added to the f32
    accumulator). Zero padding is numerically neutral here: padded hidden
    columns stay 0 through bias + ReLU and padded class columns are sliced off.
    """
    in_features, h1_dim = w1.shape
    h2_dim = w2.shape[1]
    num_classes = w3.shape[1]
    h1_pad = _round_up(h1_dim, LANE)   # 120 -> 128
    h2_pad = _round_up(h2_dim, LANE)   # 84  -> 128
    nc_pad = _round_up(num_classes, LANE)  # 2 -> 128

    def pad2(a, rows, cols):
        return jnp.pad(a, ((0, rows - a.shape[0]), (0, cols - a.shape[1])))

    return (
        pad2(w1, in_features, h1_pad).astype(jnp.bfloat16),
        pad2(b1, 1, h1_pad).astype(jnp.float32),
        pad2(w2, h1_pad, h2_pad).astype(jnp.bfloat16),
        pad2(b2, 1, h2_pad).astype(jnp.float32),
        pad2(w3, h2_pad, nc_pad).astype(jnp.bfloat16),
        pad2(b3, 1, nc_pad).astype(jnp.float32),
    )


@functools.partial(jax.jit, static_argnames=("num_classes", "tm"))
def downstream_net_forward(x, w1p, b1p, w2p, b2p, w3p, b3p, *, num_classes,
                           tm=4096):
    """Fused MLP forward on pre-padded params (see prepare_params)."""
    batch, in_features = x.shape
    h1_pad = w1p.shape[1]
    h2_pad = w2p.shape[1]
    nc_pad = w3p.shape[1]

    # Batch tile: big (per-step pipeline overhead ~0.35us makes small tiles
    # step-overhead bound), a multiple of 8 sublanes, and at most
    # ~cdiv(batch, 2) so the "parallel" axis has >=2 steps for the v7x
    # megacore whenever the batch is large enough.
    tm = _round_up(max(8, min(int(tm), 8192)), 8)
    if batch > 8:
        tm = min(tm, _round_up(pl.cdiv(batch, 2), 8))
    if tm >= batch:
        tm = batch  # single full-extent block (always a legal block dim)
    grid = (pl.cdiv(batch, tm),)

    flops = 2 * batch * (in_features * h1_pad + h1_pad * h2_pad
                         + h2_pad * nc_pad)
    bytes_accessed = (
        x.size * x.dtype.itemsize
        + (w1p.size + w2p.size + w3p.size) * 2
        + (b1p.size + b2p.size + b3p.size) * 4
        + batch * nc_pad * 2
    )

    out_padded = pl.pallas_call(
        _mlp_kernel,
        out_shape=jax.ShapeDtypeStruct((batch, nc_pad), jnp.bfloat16),
        grid_spec=pltpu.PrefetchScalarGridSpec(
            num_scalar_prefetch=0,
            grid=grid,
            in_specs=[
                pl.BlockSpec((tm, in_features), lambda i: (i, 0)),      # x tile
                pl.BlockSpec((in_features, h1_pad), lambda i: (0, 0)),  # w1 (resident)
                pl.BlockSpec((1, h1_pad), lambda i: (0, 0)),            # b1
                pl.BlockSpec((h1_pad, h2_pad), lambda i: (0, 0)),       # w2
                pl.BlockSpec((1, h2_pad), lambda i: (0, 0)),            # b2
                pl.BlockSpec((h2_pad, nc_pad), lambda i: (0, 0)),       # w3
                pl.BlockSpec((1, nc_pad), lambda i: (0, 0)),            # b3
            ],
            out_specs=pl.BlockSpec((tm, nc_pad), lambda i: (i, 0)),
        ),
        compiler_params=pltpu.CompilerParams(
            dimension_semantics=("parallel",),
            vmem_limit_bytes=48 * 1024 * 1024,
        ),
        cost_estimate=pl.CostEstimate(
            flops=flops, transcendentals=0, bytes_accessed=bytes_accessed
        ),
    )(x, w1p, b1p, w2p, b2p, w3p, b3p)

    # TODO(synk): large-batch consumers that only need argmax could consume
    #             the padded bf16 logits directly and skip this column slice.
    return out_padded[:, :num_classes].astype(jnp.float32)


def _init_linear(key, in_features, out_features):
    """Deterministic PyTorch-style init.
    Returns weight transposed to (in_features, out_features) and bias (1, out)."""
    k_w, k_b = jax.random.split(key)
    bound = 1.0 / math.sqrt(in_features)
    w = jax.random.uniform(
        k_w, (in_features, out_features), jnp.float32, -bound, bound
    )
    b = jax.random.uniform(k_b, (1, out_features), jnp.float32, -bound, bound)
    return w, b


def make_params(image_size=19, num_classes=2, key=jax.random.PRNGKey(0)):
    # Same feature-size arithmetic as the PyTorch module __init__:
    z = 0.5 * (image_size - 2)
    z = int(0.5 * (z - 2))
    in_features = 16 * z * z
    k1, k2, k3 = jax.random.split(key, 3)
    w1, b1 = _init_linear(k1, in_features, 120)
    w2, b2 = _init_linear(k2, 120, 84)
    w3, b3 = _init_linear(k3, 84, num_classes)
    return in_features, (w1, b1, w2, b2, w3, b3)


def reference_forward_f32(x, w1, b1, w2, b2, w3, b3):
    h1 = jnp.maximum(x @ w1 + b1, 0.0)
    h2 = jnp.maximum(h1 @ w2 + b2, 0.0)
    return h2 @ w3 + b3


def reference_forward_bf16(x, w1, b1, w2, b2, w3, b3):
    """Pure-JAX reference with the same bf16 operand / f32 accumulation recipe."""
    h1 = jnp.dot(x.astype(jnp.bfloat16), w1.astype(jnp.bfloat16),
                 preferred_element_type=jnp.float32) + b1
    h1 = jnp.maximum(h1, 0.0)
    h2 = jnp.dot(h1.astype(jnp.bfloat16), w2.astype(jnp.bfloat16),
                 preferred_element_type=jnp.float32) + b2
    h2 = jnp.maximum(h2, 0.0)
    return jnp.dot(h2.astype(jnp.bfloat16), w3.astype(jnp.bfloat16),
                   preferred_element_type=jnp.float32) + b3


if __name__ == "__main__":
    # Small shapes consistent with the module: image_size=19 -> z=3 ->
    # in_features = 16 * 3 * 3 = 144; num_classes=2; batch=8.
    image_size = 19
    num_classes = 2
    batch = 8

    key = jax.random.PRNGKey(0)
    k_params, k_x = jax.random.split(key)
    in_features, params = make_params(image_size, num_classes, k_params)
    padded_params = prepare_params(*params)   # one-time pad + cast

    x = jax.random.normal(k_x, (batch, in_features), jnp.float32)

    out = downstream_net_forward(x, *padded_params, num_classes=num_classes)
    out = jax.block_until_ready(out)
    assert out.shape == (batch, num_classes), out.shape
    assert out.dtype == jnp.float32, out.dtype

    # Check against a pure-JAX reference using the same bf16 recipe
    # (tolerance covers the final bf16 store rounding of the kernel output).
    ref_bf16 = reference_forward_bf16(x, *params)
    assert jnp.allclose(out, ref_bf16, atol=2e-2, rtol=2e-2), (
        f"bf16-ref max abs err {jnp.max(jnp.abs(out - ref_bf16))}"
    )

    # Loose sanity check against the full-f32 reference (bf16 operand rounding).
    ref_f32 = reference_forward_f32(x, *params)
    assert jnp.allclose(out, ref_f32, atol=1e-1, rtol=1e-1), (
        f"f32-ref max abs err {jnp.max(jnp.abs(out - ref_f32))}"
    )

    print("KERNEL_OK")
</pallas_src>

<mosaic_0001>
module attributes {stable_mosaic.version = 11 : i64} {
  func.func @_mlp_kernel(%arg0: i32, %arg1: memref<8x144xf32, #tpu.memory_space<vmem>>, %arg2: memref<144x128xbf16, #tpu.memory_space<vmem>>, %arg3: memref<1x128xf32, #tpu.memory_space<vmem>>, %arg4: memref<128x128xbf16, #tpu.memory_space<vmem>>, %arg5: memref<1x128xf32, #tpu.memory_space<vmem>>, %arg6: memref<128x128xbf16, #tpu.memory_space<vmem>>, %arg7: memref<1x128xf32, #tpu.memory_space<vmem>>, %arg8: memref<8x128xbf16, #tpu.memory_space<vmem>>) attributes {dimension_semantics = [#tpu.dimension_semantics<parallel>], iteration_bounds = array<i64: 1>, scalar_prefetch = 0 : i64, scratch_operands = 0 : i64, tpu.core_type = #tpu.core_type<tc>, window_params = [{transform_indices = @transform_0, window_bounds = array<i64: 8, 144>}, {pipeline_mode = #tpu.pipeline_mode<synchronous>, transform_indices = @transform_1, window_bounds = array<i64: 144, 128>}, {pipeline_mode = #tpu.pipeline_mode<synchronous>, transform_indices = @transform_2, window_bounds = array<i64: 1, 128>}, {pipeline_mode = #tpu.pipeline_mode<synchronous>, transform_indices = @transform_3, window_bounds = array<i64: 128, 128>}, {pipeline_mode = #tpu.pipeline_mode<synchronous>, transform_indices = @transform_4, window_bounds = array<i64: 1, 128>}, {pipeline_mode = #tpu.pipeline_mode<synchronous>, transform_indices = @transform_5, window_bounds = array<i64: 128, 128>}, {pipeline_mode = #tpu.pipeline_mode<synchronous>, transform_indices = @transform_6, window_bounds = array<i64: 1, 128>}, {transform_indices = @transform_7, window_bounds = array<i64: 8, 128>}]} {
    %c0 = arith.constant 0 : index
    %c0_0 = arith.constant 0 : index
    %0 = vector.load %arg1[%c0, %c0_0] : memref<8x144xf32, #tpu.memory_space<vmem>>, vector<8x144xf32>
    %1 = arith.truncf %0 : vector<8x144xf32> to vector<8x144xbf16>
    %c0_1 = arith.constant 0 : index
    %c0_2 = arith.constant 0 : index
    %2 = vector.load %arg2[%c0_1, %c0_2] : memref<144x128xbf16, #tpu.memory_space<vmem>>, vector<144x128xbf16>
    %cst = arith.constant dense<0.000000e+00> : vector<8x128xf32>
    %3 = tpu.matmul %1, %2, %cst {dimension_numbers = #tpu.dot_dimension_numbers<[1], [0], [0], [1], [0, 0, 1, 1], [], []>} : vector<8x144xbf16>, vector<144x128xbf16>, vector<8x128xf32> -> vector<8x128xf32>
    %c0_3 = arith.constant 0 : index
    %c0_4 = arith.constant 0 : index
    %4 = vector.load %arg3[%c0_3, %c0_4] : memref<1x128xf32, #tpu.memory_space<vmem>>, vector<1x128xf32>
    %5 = vector.broadcast %4 : vector<1x128xf32> to vector<8x128xf32>
    %6 = arith.addf %3, %5 : vector<8x128xf32>
    %cst_5 = arith.constant 0.000000e+00 : f32
    %7 = vector.broadcast %cst_5 : f32 to vector<8x128xf32>
    %8 = arith.maximumf %6, %7 : vector<8x128xf32>
    %9 = arith.truncf %8 : vector<8x128xf32> to vector<8x128xbf16>
    %c0_6 = arith.constant 0 : index
    %c0_7 = arith.constant 0 : index
    %10 = vector.load %arg4[%c0_6, %c0_7] : memref<128x128xbf16, #tpu.memory_space<vmem>>, vector<128x128xbf16>
    %cst_8 = arith.constant dense<0.000000e+00> : vector<8x128xf32>
    %11 = tpu.matmul %9, %10, %cst_8 {dimension_numbers = #tpu.dot_dimension_numbers<[1], [0], [0], [1], [0, 0, 1, 1], [], []>} : vector<8x128xbf16>, vector<128x128xbf16>, vector<8x128xf32> -> vector<8x128xf32>
    %c0_9 = arith.constant 0 : index
    %c0_10 = arith.constant 0 : index
    %12 = vector.load %arg5[%c0_9, %c0_10] : memref<1x128xf32, #tpu.memory_space<vmem>>, vector<1x128xf32>
    %13 = vector.broadcast %12 : vector<1x128xf32> to vector<8x128xf32>
    %14 = arith.addf %11, %13 : vector<8x128xf32>
    %cst_11 = arith.constant 0.000000e+00 : f32
    %15 = vector.broadcast %cst_11 : f32 to vector<8x128xf32>
    %16 = arith.maximumf %14, %15 : vector<8x128xf32>
    %17 = arith.truncf %16 : vector<8x128xf32> to vector<8x128xbf16>
    %c0_12 = arith.constant 0 : index
    %c0_13 = arith.constant 0 : index
    %18 = vector.load %arg6[%c0_12, %c0_13] : memref<128x128xbf16, #tpu.memory_space<vmem>>, vector<128x128xbf16>
    %cst_14 = arith.constant dense<0.000000e+00> : vector<8x128xf32>
    %19 = tpu.matmul %17, %18, %cst_14 {dimension_numbers = #tpu.dot_dimension_numbers<[1], [0], [0], [1], [0, 0, 1, 1], [], []>} : vector<8x128xbf16>, vector<128x128xbf16>, vector<8x128xf32> -> vector<8x128xf32>
    %c0_15 = arith.constant 0 : index
    %c0_16 = arith.constant 0 : index
    %20 = vector.load %arg7[%c0_15, %c0_16] : memref<1x128xf32, #tpu.memory_space<vmem>>, vector<1x128xf32>
    %21 = vector.broadcast %20 : vector<1x128xf32> to vector<8x128xf32>
    %22 = arith.addf %19, %21 : vector<8x128xf32>
    %23 = arith.truncf %22 : vector<8x128xf32> to vector<8x128xbf16>
    %c0_17 = arith.constant 0 : index
    %c0_18 = arith.constant 0 : index
    %24 = vector.load %arg8[%c0_17, %c0_18] : memref<8x128xbf16, #tpu.memory_space<vmem>>, vector<8x128xbf16>
    tpu.vector_store %arg8[%c0_17, %c0_18], %23 {strides = array<i32>} : memref<8x128xbf16, #tpu.memory_space<vmem>>, vector<8x128xbf16>,
    return
  }
  func.func @transform_0(%arg0: i32) -> (i32, i32) {
    %c0_i32 = arith.constant 0 : i32
    %c0_i32_0 = arith.constant 0 : i32
    return %arg0, %c0_i32 : i32, i32
  }
  func.func @transform_1(%arg0: i32) -> (i32, i32) {
    %c0_i32 = arith.constant 0 : i32
    %c0_i32_0 = arith.constant 0 : i32
    %c0_i32_1 = arith.constant 0 : i32
    return %c0_i32, %c0_i32_0 : i32, i32
  }
  func.func @transform_2(%arg0: i32) -> (i32, i32) {
    %c0_i32 = arith.constant 0 : i32
    %c0_i32_0 = arith.constant 0 : i32
    %c0_i32_1 = arith.constant 0 : i32
    return %c0_i32, %c0_i32_0 : i32, i32
  }
  func.func @transform_3(%arg0: i32) -> (i32, i32) {
    %c0_i32 = arith.constant 0 : i32
    %c0_i32_0 = arith.constant 0 : i32
    %c0_i32_1 = arith.constant 0 : i32
    return %c0_i32, %c0_i32_0 : i32, i32
  }
  func.func @transform_4(%arg0: i32) -> (i32, i32) {
    %c0_i32 = arith.constant 0 : i32
    %c0_i32_0 = arith.constant 0 : i32
    %c0_i32_1 = arith.constant 0 : i32
    return %c0_i32, %c0_i32_0 : i32, i32
  }
  func.func @transform_5(%arg0: i32) -> (i32, i32) {
    %c0_i32 = arith.constant 0 : i32
    %c0_i32_0 = arith.constant 0 : i32
    %c0_i32_1 = arith.constant 0 : i32
    return %c0_i32, %c0_i32_0 : i32, i32
  }
  func.func @transform_6(%arg0: i32) -> (i32, i32) {
    %c0_i32 = arith.constant 0 : i32
    %c0_i32_0 = arith.constant 0 : i32
    %c0_i32_1 = arith.constant 0 : i32
    return %c0_i32, %c0_i32_0 : i32, i32
  }
  func.func @transform_7(%arg0: i32) -> (i32, i32) {
    %c0_i32 = arith.constant 0 : i32
    %c0_i32_0 = arith.constant 0 : i32
    return %arg0, %c0_i32 : i32, i32
  }
}

</mosaic_0001>

<bundles_post_ra>
// kernel: downstream_net_forward.1
= control target key start
LH: loop header
LB: loop body
LE: loop exit
PB: predicated region body
PF: predicated region fallthrough
CT: control target
= control target key end

     0   :  { %12 = vsyncpa [#allocation3], 0  ;;  %s793_s0 = inlined_call_operand.hbm [shape: f32[8,144], index: 0, kind: input, shape index: {}]   ;;  %s794_s1 = inlined_call_operand.hbm [shape: bf16[144,128], index: 1, kind: input, shape index: {}]   ;;  %s795_s2 = inlined_call_operand.vmem [shape: f32[1,128], index: 2, kind: input, shape index: {}]   ;;  %s796_s3 = inlined_call_operand.hbm [shape: bf16[128,128], index: 3, kind: input, shape index: {}]   ;;  %s797_s4 = inlined_call_operand.vmem [shape: f32[1,128], index: 4, kind: input, shape index: {}]   ;;  %s798_s5 = inlined_call_operand.hbm [shape: bf16[128,128], index: 5, kind: input, shape index: {}]   ;;  %s799_s6 = inlined_call_operand.vmem [shape: f32[1,128], index: 6, kind: input, shape index: {}]   ;;  %s800_s7 = inlined_call_operand.vmem [shape: bf16[8,128], index: 7, kind: output, shape index: {}]  }
   0x1   :  { %13 = vsyncpa [#allocation5], 0 }
   0x2   :  { %14 = vsyncpa [#allocation8], 0  ;;  %s657_s24 = smov [#allocation4]   ;;  %s563_s28 = scalar_lea.hbm %s794_s1, 1152 }
   0x3   :  { %s30_s25 = sshll.u32 %s657_s24, 4  ;;  %p564_p0 = scmp.ne.s32.totalorder %s794_s1, %s563_s28  ;;  %s31_s25 = int_to_ptr.vmem [resolvable:$true] %s30_s25 }
   0x4   :  { %p567_p1 = scmp.lt.u32.totalorder %s563_s28, %s794_s1 }
   0x6   :  { %p569_p2 = pnand %p567_p1, %p564_p0 }
   0x8   :  { %572 = shalt.err (!%p569_p2)
}
   0x9   :  { %s573_s10 = scalar_lea.vmem %s31_s25, 1152  ;;  %p578_p4 = scmp.lt.s32.totalorder %s31_s25, %s31_s25 }
   0xa   :  { %p574_p3 = scmp.ne.s32.totalorder %s31_s25, %s573_s10  ;;  %p579_p5 = scmp.lt.s32.totalorder %s573_s10, %s573_s10 }
   0xc   :  { %p580_p6 = por %p579_p5, %p578_p4 }
   0xe   :  { %p581_p7 = pnand %p580_p6, %p574_p3 }
  0x10   :  { %584 = shalt.err (!%p581_p7)
}
  0x11   :  { %s658_s11 = smov 64   ;;  %s659_s12 = smov 4  }
  0x12   :  { %36 = dma.hbm_to_vmem [thread:$0]  %s794_s1, 1152, %s31_s25, [#allocation5], %s658_s11, %s658_s11, %s659_s12  }
  0x13   :  { %s660_s15 = smov [#allocation2]   ;;  %s661_s17 = smov [#allocation6]  }
  0x14   :  { %s21_s16 = sshll.u32 %s660_s15, 4  ;;  %s44_s18 = sshll.u32 %s661_s17, 4  ;;  %s22_s16 = int_to_ptr.vmem [resolvable:$true] %s21_s16  ;;  %s45_s18 = int_to_ptr.vmem [resolvable:$true] %s44_s18 }
  0x15   :  { %s585_s21 = scalar_lea.hbm %s793_s0, 256 }
  0x16   :  { %p586_p8 = scmp.ne.s32.totalorder %s793_s0, %s585_s21  ;;  %p589_p9 = scmp.lt.u32.totalorder %s585_s21, %s793_s0 }
  0x18   :  { %p591_p10 = pnand %p589_p9, %p586_p8 }
  0x1a   :  { %594 = shalt.err (!%p591_p10)
}
  0x1b   :  { %s595_s1 = scalar_lea.vmem %s22_s16, 256  ;;  %p600_p12 = scmp.lt.s32.totalorder %s22_s16, %s22_s16 }
  0x1c   :  { %p596_p11 = scmp.ne.s32.totalorder %s22_s16, %s595_s1  ;;  %p601_p13 = scmp.lt.s32.totalorder %s595_s1, %s595_s1 }
  0x1e   :  { %p602_p0 = por %p601_p13, %p600_p12 }
  0x20   :  { %p603_p1 = pnand %p602_p0, %p596_p11 }
  0x22   :  { %606 = shalt.err (!%p603_p1)
}
  0x23   :  { %24 = dma.hbm_to_vmem [thread:$0]  %s793_s0, 256, %s22_s16, [#allocation3]  }
  0x24   :  { %s607_s30 = scalar_lea.hbm %s796_s3, 1024 }
  0x25   :  { %p608_p2 = scmp.ne.s32.totalorder %s796_s3, %s607_s30  ;;  %p611_p3 = scmp.lt.u32.totalorder %s607_s30, %s796_s3 }
  0x27   :  { %p613_p4 = pnand %p611_p3, %p608_p2 }
  0x29   :  { %616 = shalt.err (!%p613_p4)
}
  0x2a   :  { %s617_s14 = scalar_lea.vmem %s45_s18, 1024  ;;  %p622_p6 = scmp.lt.s32.totalorder %s45_s18, %s45_s18 }
  0x2b   :  { %p618_p5 = scmp.ne.s32.totalorder %s45_s18, %s617_s14  ;;  %p623_p7 = scmp.lt.s32.totalorder %s617_s14, %s617_s14 }
  0x2d   :  { %p624_p8 = por %p623_p7, %p622_p6 }
  0x2f   :  { %p625_p9 = pnand %p624_p8, %p618_p5 }
  0x31   :  { %628 = shalt.err (!%p625_p9)
}
  0x32   :  { %50 = dma.hbm_to_vmem [thread:$0]  %s796_s3, 1024, %s45_s18, [#allocation5], %s658_s11, %s658_s11, %s659_s12  }
  0x33   :  { %s662_s16 = smov [#allocation7]   ;;  %s629_s21 = scalar_lea.hbm %s798_s5, 1024 }
  0x34   :  { %s58_s17 = sshll.u32 %s662_s16, 4  ;;  %p630_p10 = scmp.ne.s32.totalorder %s798_s5, %s629_s21  ;;  %s59_s17 = int_to_ptr.vmem [resolvable:$true] %s58_s17 }
  0x35   :  { %p633_p11 = scmp.lt.u32.totalorder %s629_s21, %s798_s5 }
  0x37   :  { %p635_p12 = pnand %p633_p11, %p630_p10 }
  0x39   :  { %638 = shalt.err (!%p635_p12)
}
  0x3a   :  { %s639_s1 = scalar_lea.vmem %s59_s17, 1024  ;;  %p644_p0 = scmp.lt.s32.totalorder %s59_s17, %s59_s17 }
  0x3b   :  { %p640_p13 = scmp.ne.s32.totalorder %s59_s17, %s639_s1  ;;  %p645_p1 = scmp.lt.s32.totalorder %s639_s1, %s639_s1 }
  0x3d   :  { %p646_p2 = por %p645_p1, %p644_p0 }
  0x3f   :  { %p647_p3 = pnand %p646_p2, %p640_p13 }
  0x41   :  { %650 = shalt.err (!%p647_p3)
}
  0x42   :  { %64 = dma.hbm_to_vmem [thread:$0]  %s798_s5, 1024, %s59_s17, [#allocation8], %s658_s11, %s658_s11, %s659_s12  }
  0x43   :  { %651 = dma.done.wait [#allocation3], 256  }
  0x44   :  { %652 = vsyncadd [#allocation3], 4294967040 }
  0x45   :  { %653 = dma.done.wait [#allocation5], 2176  }
  0x46   :  { %654 = vsyncadd [#allocation5], 4294965120 }
  0x47   :  { %655 = dma.done.wait [#allocation8], 1024  }
  0x48   :  { %656 = vsyncadd [#allocation8], 4294966272  ;;  %v663_v0 = vmov 0   ;;  %v664_v1 = vmov 0.0   ;;  %v538_v2 = vld [vmem:[#allocation4] sm:$0xff]   ;;  %v539_v3 = vld [vmem:[#allocation4 + $0x8] sm:$0xff]  }
  0x49   :  { %167 = vmatprep.subr.bf16.mxu0 %v663_v0  ;;  %489 = vmatprep.subr.bf16.mxu1 %v664_v1  ;;  %v540_v4 = vld [vmem:[#allocation4 + $0x10] sm:$0xff]   ;;  %v541_v5 = vld [vmem:[#allocation4 + $0x18] sm:$0xff]   ;;  %vm163_vm0 = vcmask 130048   ;;  %v547_v8 = vld [vmem:[#allocation6] sm:$0xff]   ;;  %vm665_vm1 = vmmov 0  }
  0x4a   :  { %168 = vmatpush1.bf16.msra.mxu0 %v538_v2  ;;  %v81_v6 = vld [vmem:[#allocation2 + $0x8] sm:$0xff]  ;;  %490 = vmatpush3.bf16.msra.mxu1 %v547_v8  ;;  %v548_v9 = vld [vmem:[#allocation6 + $0x8] sm:$0xff]   ;;  %v542_v10 = vld [vmem:[#allocation4 + $0x20] sm:$0xff]  }
  0x4b   :  { %169 = vmatprep.subr.bf16.mxu0 %v663_v0  ;;  %v83_v7 = vpack.c.bf16 %v81_v6, %v81_v6  ;;  %491 = vmatprep.subr.bf16.mxu1 %v664_v1  ;;  %v549_v11 = vld [vmem:[#allocation6 + $0x10] sm:$0xff]   ;;  %v543_v12 = vld [vmem:[#allocation4 + $0x28] sm:$0xff]   ;;  %v550_v13 = vld [vmem:[#allocation6 + $0x18] sm:$0xff]  }
  0x4c   :  { %v544_v14 = vld [vmem:[#allocation4 + $0x30] sm:$0xff]   ;;  %v551_v15 = vld [vmem:[#allocation6 + $0x20] sm:$0xff]   ;;  %v545_v16 = vld [vmem:[#allocation4 + $0x38] sm:$0xff]   ;;  %505 = vmatprep.mubr.msk.bf16.mxu1 %vm665_vm1, %v664_v1 }
  0x4d   :  { %452 = vmatprep.mubr.msk.bf16.mxu0 %vm163_vm0, %v83_v7  ;;  %v552_v17 = vld [vmem:[#allocation6 + $0x28] sm:$0xff]   ;;  %v546_v18 = vld [vmem:[#allocation4 + $0x40] sm:$0xff]   ;;  %v553_v21 = vld [vmem:[#allocation6 + $0x30] sm:$0xff]  }
  0x4e   :  { %170 = vmatpush1.bf16.msra.mxu0 %v539_v3  ;;  %492 = vmatpush3.bf16.msra.mxu1 %v548_v9  ;;  %v80_v19 = vld [vmem:[#allocation2] sm:$0xff]  ;;  %v554_v22 = vld [vmem:[#allocation6 + $0x38] sm:$0xff]   ;;  %v555_v30 = vld [vmem:[#allocation7] sm:$0xff]  }
  0x4f   :  { %171 = vmatprep.subr.bf16.mxu0 %v663_v0  ;;  %493 = vmatprep.subr.bf16.mxu1 %v664_v1  ;;  %v82_v20 = vpack.c.bf16 %v80_v19, %v80_v19  ;;  %v442_v23 = vld [vmem:[%s795_s2] ss:$0 sm:$0xff]  ;;  %v557_v33 = vld [vmem:[#allocation7 + $0x10] sm:$0xff]   ;;  %v558_v34 = vld [vmem:[#allocation7 + $0x18] sm:$0xff]  }
  0x50   :  { %v556_v32 = vld [vmem:[#allocation7 + $0x8] sm:$0xff]   ;;  %v559_v35 = vld [vmem:[#allocation7 + $0x20] sm:$0xff]   ;;  %v561_v37 = vld [vmem:[#allocation7 + $0x30] sm:$0xff]  }
  0x51   :  { %v560_v36 = vld [vmem:[#allocation7 + $0x28] sm:$0xff]   ;;  %v562_v38 = vld [vmem:[#allocation7 + $0x38] sm:$0xff]  }
  0x52   :  { %172 = vmatpush1.bf16.msra.mxu0 %v540_v4  ;;  %494 = vmatpush3.bf16.msra.mxu1 %v549_v11  ;;  %v453_v39 = vld [vmem:[%s797_s4] ss:$0 sm:$0xff] }
  0x53   :  { %173 = vmatprep.subr.bf16.mxu0 %v663_v0  ;;  %495 = vmatprep.subr.bf16.mxu1 %v664_v1  ;;  %v462_v47 = vld [vmem:[%s799_s6] ss:$0 sm:$0xff] }
  0x56   :  { %174 = vmatpush1.bf16.msra.mxu0 %v541_v5  ;;  %496 = vmatpush3.bf16.msra.mxu1 %v550_v13 }
  0x57   :  { %175 = vmatprep.subr.bf16.mxu0 %v663_v0  ;;  %497 = vmatprep.subr.bf16.mxu1 %v664_v1 }
  0x5a   :  { %176 = vmatpush1.bf16.msra.mxu0 %v542_v10  ;;  %498 = vmatpush3.bf16.msra.mxu1 %v551_v15 }
  0x5b   :  { %177 = vmatprep.subr.bf16.mxu0 %v663_v0  ;;  %499 = vmatprep.subr.bf16.mxu1 %v664_v1 }
  0x5e   :  { %178 = vmatpush1.bf16.msra.mxu0 %v543_v12  ;;  %500 = vmatpush3.bf16.msra.mxu1 %v552_v17 }
  0x5f   :  { %179 = vmatprep.subr.bf16.mxu0 %v663_v0  ;;  %501 = vmatprep.subr.bf16.mxu1 %v664_v1 }
  0x62   :  { %180 = vmatpush1.bf16.msra.mxu0 %v544_v14  ;;  %502 = vmatpush3.bf16.msra.mxu1 %v553_v21 }
  0x63   :  { %181 = vmatprep.subr.bf16.mxu0 %v663_v0  ;;  %503 = vmatprep.subr.bf16.mxu1 %v664_v1 }
  0x66   :  { %182 = vmatpush1.bf16.msra.mxu0 %v545_v16  ;;  %504 = vmatpush3.bf16.msra.mxu1 %v554_v22 }
  0x67   :  { %183 = vmatprep.subr.bf16.mxu0 %v663_v0  ;;  %509 = vmatprep.subr.bf16.mxu1 %v664_v1 }
  0x6a   :  { %184 = vmatpush1.bf16.msra.mxu0 %v546_v18 }
  0x6d   :  { %200 = vmatmul.mubr.bf16.vlgmr.msra.gmra.mrb[0].mxu0 %v82_v20 }
 0x140   :  { %v201_v24 = vpop.f32.mrb[0].mxu0 }
 0x141   :  { %v202_v25 = vadd.f32 %v442_v23, %v201_v24  ;;  %v203_v26 = vpop.f32.mrb[1].mxu0 }
 0x142   :  { %v204_v27 = vpop.f32.mrb[2].mxu0 }
 0x143   :  { %v207_v28 = vmax.f32 %v202_v25, 0.0  ;;  %v205_v29 = vpop.f32.mrb[3].mxu0 }
 0x145   :  { %v208_v31 = vpack.c.bf16 %v207_v28, %v207_v28 }
 0x147   :  { %506 = vmatmul.mubr.bf16.vlgmr.msra.gmra.mrb[0].mxu1 %v208_v31 }
 0x148   :  { %510 = vmatpush3.bf16.msra.mxu1 %v555_v30  ;;  %525 = vmatprep.mubr.msk.bf16.mxu1 %vm665_vm1, %v664_v1 }
 0x149   :  { %511 = vmatprep.subr.bf16.mxu1 %v664_v1 }
 0x14c   :  { %512 = vmatpush3.bf16.msra.mxu1 %v556_v32 }
 0x14d   :  { %513 = vmatprep.subr.bf16.mxu1 %v664_v1 }
 0x150   :  { %514 = vmatpush3.bf16.msra.mxu1 %v557_v33 }
 0x151   :  { %515 = vmatprep.subr.bf16.mxu1 %v664_v1 }
 0x154   :  { %516 = vmatpush3.bf16.msra.mxu1 %v558_v34 }
 0x155   :  { %517 = vmatprep.subr.bf16.mxu1 %v664_v1 }
 0x158   :  { %518 = vmatpush3.bf16.msra.mxu1 %v559_v35 }
 0x159   :  { %519 = vmatprep.subr.bf16.mxu1 %v664_v1 }
 0x15c   :  { %520 = vmatpush3.bf16.msra.mxu1 %v560_v36 }
 0x15d   :  { %521 = vmatprep.subr.bf16.mxu1 %v664_v1 }
 0x160   :  { %522 = vmatpush3.bf16.msra.mxu1 %v561_v37 }
 0x161   :  { %523 = vmatprep.subr.bf16.mxu1 %v664_v1 }
 0x164   :  { %524 = vmatpush3.bf16.msra.mxu1 %v562_v38 }
 0x21a   :  { %v314_v40 = vpop.f32.mrb[0].mxu1 }
 0x21b   :  { %v315_v41 = vadd.f32 %v453_v39, %v314_v40  ;;  %v507_v42 = vpop.f32.mrb[1].mxu1 }
 0x21c   :  { %v317_v43 = vpop.f32.mrb[2].mxu1 }
 0x21d   :  { %v320_v44 = vmax.f32 %v315_v41, 0.0  ;;  %v508_v45 = vpop.f32.mrb[3].mxu1 }
 0x21f   :  { %v321_v46 = vpack.c.bf16 %v320_v44, %v320_v44 }
 0x221   :  { %526 = vmatmul.mubr.bf16.vlgmr.msra.gmra.mrb[4].mxu1 %v321_v46 }
 0x2f4   :  { %v427_v48 = vpop.f32.mrb[4].mxu1 }
 0x2f5   :  { %v428_v49 = vadd.f32 %v462_v47, %v427_v48  ;;  %v527_v50 = vpop.f32.mrb[5].mxu1 }
 0x2f6   :  { %v430_v51 = vpop.f32.mrb[6].mxu1 }
 0x2f7   :  { %v433_v52 = vpack.c.bf16 %v428_v49, %v428_v49  ;;  %v528_v53 = vpop.f32.mrb[7].mxu1 }
 0x2f9   :  { %434 = vst [vmem:[%s800_s7] sm:$0xf] %v433_v52 }
 0x2fa   :  { %439 = vsyncpa [#allocation3], 1 }
 0x2fb   :  { %440 = vsyncpa [#allocation5], 1 }
 0x2fc   :  { %441 = vsyncpa [#allocation8], 1 }

</bundles_post_ra>
